<compile_context>
chip_gen: v6e
topology: v6e:2x2x1
jax: 0.10.0
libtpu: 0.0.40
codegen_flags: <defaults>
</compile_context>

<pallas_src>
import jax
import jax.numpy as jnp
from jax.experimental import pallas as pl
from jax.experimental.pallas import tpu as pltpu

_LANES = 128  # lane (fast) axis width of a vreg


def _identity_decode_kernel(z_ref, o_ref):
    # TODO(synk): NodeEdgeDecoder.forward is an empty stub in the reference
    # module (no parameters, body is only a docstring), so there is no
    # node/edge decoding math to translate.  This tile copy is the scaffold.
    # When real decode matmuls land:
    #   * K as the innermost "arbitrary" grid axis, f32 VMEM accumulator
    #     scratch, jnp.dot(..., preferred_element_type=jnp.float32).
    #   * v6e/v7x: N/M tiles multiples of 256 (2x256^2 MXU); v5e: multiples of
    #     128 are sufficient (4x128^2 MXU) and halve the accumulator footprint.
    #   * v7x: re-derive the weight/activation tiling for 64 MiB physical /
    #     32 MiB scoped VMEM (a K-resident weight block sized for v6e's
    #     128 MiB will NOT fit); note v7x's MXU has no int8 path (fp8 only),
    #     so an int8-quantized decoder needs a different plan than v5e/v6e.
    #   * v5e: budget the f32 accumulator plus double-buffered operands
    #     against the 16 MiB default scoped VMEM.
    #   * Drop input_output_aliases if the decode changes output shape/dtype.
    o_ref[...] = z_ref[...]


def _sublane_multiple(dtype) -> int:
    # f32 -> 8 sublanes, bf16/f16 -> 16, int8/fp8 -> 32.
    return {4: 8, 2: 16, 1: 32}.get(jnp.dtype(dtype).itemsize, 8)


def _round_up(x: int, m: int) -> int:
    return ((x + m - 1) // m) * m


def _tile_budget_bytes() -> tuple[int, int]:
    """(per-block byte budget, scoped-VMEM limit) chosen per TPU generation.

    v7x has ~3.2 TB/s HBM/chip so sub-MiB blocks are dominated by the fixed
    per-step overhead -> 4 MiB blocks (2 in + 2 out bufs = 16 MiB, within its
    32 MiB scoped default / 64 MiB physical).  v5e's default scoped VMEM is
    only 16 MiB -> cap blocks at 2 MiB (8 MiB of buffers).  v6e: 2 MiB blocks
    already sit at ~86% of roofline.
    """
    kind = ""
    try:
        kind = jax.devices()[0].device_kind.lower()
    except Exception:  # pragma: no cover - conservative fallback
        pass
    if "v7" in kind:
        tile = 4 * 1024 * 1024
    elif ("v5 lite" in kind) or ("v5e" in kind) or ("v5lite" in kind):
        tile = 2 * 1024 * 1024
    else:  # v6e and default
        tile = 2 * 1024 * 1024
    # Explicit scoped-VMEM limit with 2x headroom over the 4 double-buffered
    # blocks; never exceeds any generation's physical VMEM.
    return tile, 8 * tile


def _launch_identity(x2d: jax.Array, tile_rows: int, vmem_limit: int) -> jax.Array:
    rows, cols = x2d.shape
    itemsize = jnp.dtype(x2d.dtype).itemsize
    return pl.pallas_call(
        _identity_decode_kernel,
        out_shape=jax.ShapeDtypeStruct((rows, cols), x2d.dtype),
        grid=(rows // tile_rows,),
        in_specs=[pl.BlockSpec((tile_rows, cols), lambda i: (i, 0))],
        out_specs=pl.BlockSpec((tile_rows, cols), lambda i: (i, 0)),
        # Alias saves the output HBM *allocation* only; the VMEM->HBM
        # writeback still happens, so this path still moves 2N bytes of HBM
        # traffic.  The default (no-kernel) path is the only zero-traffic one.
        input_output_aliases={0: 0},
        cost_estimate=pl.CostEstimate(
            flops=0,
            transcendentals=0,
            bytes_accessed=2 * rows * cols * itemsize,
        ),
        compiler_params=pltpu.CompilerParams(
            # Row grid is embarrassingly parallel -> both v7x TensorCores.
            dimension_semantics=("parallel",),
            vmem_limit_bytes=vmem_limit,
        ),
    )(x2d)


def _aligned_tile_rows(rows: int, row_bytes: int, sub: int, tile_bytes: int):
    """Largest tile_r that divides rows, is a multiple of `sub` (or == rows),
    and keeps a block <= tile_bytes.  None -> no legal choice (use slab path)."""
    if rows * row_bytes <= tile_bytes:
        return rows  # whole array as one full-extent block (always legal)
    max_rows = tile_bytes // row_bytes
    r = (max_rows // sub) * sub
    while r >= sub:
        if rows % r == 0:
            return r
        r -= sub
    return None


def _decode_impl(z: jax.Array) -> jax.Array:
    tile_bytes, vmem_limit = _tile_budget_bytes()
    itemsize = jnp.dtype(z.dtype).itemsize
    sub = _sublane_multiple(z.dtype)
    orig_shape = z.shape
    n = z.size

    # ---- Fast path: last dim already lane aligned -> no pad, no slice. ----
    if z.ndim >= 2 and z.shape[-1] % _LANES == 0 and n > 0:
        cols = z.shape[-1]
        rows = n // cols
        tile_rows = _aligned_tile_rows(rows, cols * itemsize, sub, tile_bytes)
        if tile_rows is not None:
            out = _launch_identity(z.reshape(rows, cols), tile_rows, vmem_limit)
            return out.reshape(orig_shape)

    # ---- Generic path: fold into a lane-dense (rows, 128) slab. ----
    rows_needed = pl.cdiv(max(n, 1), _LANES)
    target_rows = max(sub, (tile_bytes // (_LANES * itemsize)) // sub * sub)
    tile_rows = min(target_rows, _round_up(rows_needed, sub))
    padded_rows = _round_up(rows_needed, tile_rows)
    padded_n = padded_rows * _LANES

    flat = z.reshape(-1)
    if padded_n != n:
        # Pad/slice are separate HLO passes (extra HBM traffic); only taken
        # when the shape is not lane aligned.
        flat = jnp.pad(flat, (0, padded_n - n))
    slab = flat.reshape(padded_rows, _LANES)

    out = _launch_identity(slab, tile_rows, vmem_limit)

    out_flat = out.reshape(-1)
    if padded_n != n:
        out_flat = out_flat[:n]
    return out_flat.reshape(orig_shape)


_decode_via_kernel = jax.jit(_decode_impl)


def node_edge_decoder(z: jax.Array, *, force_kernel: bool = False) -> jax.Array:
    """Pallas equivalent of NodeEdgeDecoder().forward(z).

    The reference forward is a parameterless no-op, so the highest-value path
    is to launch no kernel at all (zero HBM traffic, zero launch overhead).
    Set force_kernel=True to exercise the tiled Pallas scaffold that real
    decode compute will slot into.
    """
    if not force_kernel:
        return z
    return _decode_via_kernel(z)


if __name__ == "__main__":
    key = jax.random.PRNGKey(0)
    k1, k2 = jax.random.split(key)

    # "Decode a random Gaussian vector": small latent batch, batch=2, dim=32.
    z = jax.random.normal(k1, (2, 32), dtype=jnp.float32)
    # Lane-aligned latent (last dim % 128 == 0) exercises the no-pad path.
    z_aligned = jax.random.normal(k2, (16, 256), dtype=jnp.float32)

    # Default (optimized) path: no kernel launch at all.
    out_fast = node_edge_decoder(z)

    # Scaffold Pallas path: slab + pad (2x32 is not lane aligned).
    out_kernel = jax.block_until_ready(node_edge_decoder(z, force_kernel=True))
    # Scaffold Pallas path: direct, no pad / slice (last dim is 256).
    out_kernel_aligned = jax.block_until_ready(
        node_edge_decoder(z_aligned, force_kernel=True))

    assert out_kernel.shape == z.shape and out_kernel.dtype == z.dtype
    assert out_kernel_aligned.shape == z_aligned.shape
    assert bool(jnp.allclose(out_kernel, z))
    assert bool(jnp.allclose(out_kernel_aligned, z_aligned))
    assert bool(jnp.allclose(out_fast, z))

    print("KERNEL_OK")
</pallas_src>

<mosaic_0001>
module attributes {stable_mosaic.version = 11 : i64} {
  func.func @_identity_decode_kernel(%arg0: i32, %arg1: memref<8x128xf32, #tpu.memory_space<vmem>>, %arg2: memref<8x128xf32, #tpu.memory_space<vmem>>) attributes {dimension_semantics = [#tpu.dimension_semantics<parallel>], iteration_bounds = array<i64: 1>, scalar_prefetch = 0 : i64, scratch_operands = 0 : i64, tpu.core_type = #tpu.core_type<tc>, window_params = [{transform_indices = @transform_0, window_bounds = array<i64: 8, 128>}, {transform_indices = @transform_1, window_bounds = array<i64: 8, 128>}]} {
    %c0 = arith.constant 0 : index
    %c0_0 = arith.constant 0 : index
    %0 = vector.load %arg1[%c0, %c0_0] : memref<8x128xf32, #tpu.memory_space<vmem>>, vector<8x128xf32>
    %c0_1 = arith.constant 0 : index
    %c0_2 = arith.constant 0 : index
    %1 = vector.load %arg2[%c0_1, %c0_2] : memref<8x128xf32, #tpu.memory_space<vmem>>, vector<8x128xf32>
    tpu.vector_store %arg2[%c0_1, %c0_2], %0 {strides = array<i32>} : memref<8x128xf32, #tpu.memory_space<vmem>>, vector<8x128xf32>,
    return
  }
  func.func @transform_0(%arg0: i32) -> (i32, i32) {
    %c0_i32 = arith.constant 0 : i32
    %c0_i32_0 = arith.constant 0 : i32
    return %arg0, %c0_i32 : i32, i32
  }
  func.func @transform_1(%arg0: i32) -> (i32, i32) {
    %c0_i32 = arith.constant 0 : i32
    %c0_i32_0 = arith.constant 0 : i32
    return %arg0, %c0_i32 : i32, i32
  }
}

</mosaic_0001>

<bundles_post_ra>
// kernel: _decode_impl.1
= control target key start
LH: loop header
LB: loop body
LE: loop exit
PB: predicated region body
PF: predicated region fallthrough
CT: control target
= control target key end

     0   :  { %s30_s0 = inlined_call_operand.vmem [shape: f32[8,128], index: 0, kind: input, shape index: {}, may-alias: {0,1}]   ;;  %s31_s1 = inlined_call_operand.vmem [shape: f32[8,128], index: 1, kind: output, shape index: {}, may-alias: {0,1}]  }
   0x1   :  { %v8_v0 = vld [vmem:[%s30_s0] sm:$0xff] }
   0x2   :  { %9 = vst [vmem:[%s31_s1] sm:$0xff] %v8_v0 }

</bundles_post_ra>
